<compile_context>
chip_gen: v7x
topology: tpu7x:2x2x1
jax: 0.10.0
libtpu: 0.0.40
codegen_flags: <defaults>
</compile_context>

<pallas_src>
import jax
import jax.numpy as jnp
from jax import lax
from jax.experimental import pallas as pl
from jax.experimental.pallas import tpu as pltpu


_LN_EPS = 1e-5


def _pick_tile(dim, cap, mult):
    """Largest multiple-of-`mult` divisor of `dim` that is <= cap, else `dim` (full)."""
    if dim <= cap:
        return dim
    t = (cap // mult) * mult
    while t >= mult:
        if dim % t == 0:
            return t
        t -= mult
    return dim  # fall back to an untiled (full) dimension


def modlin2d_kernel(code_ref, wct_full_ref, wct_k_ref, g_ref, beta_ref, b_ref,
                    x_ref, wt_ref, o_ref, mu_ref, rstd_ref, acc_ref):
    """One grid step = (function block f, seq block s, out-feature block n, K step k).

    code_ref     : (TF, dcond)   code.T rows of this function block
    wct_full_ref : (dcond, din)  full w_c.T (LN statistics need the full din)
    wct_k_ref    : (dcond, TK)   K-slice of w_c.T (same array, blocked spec)
    g_ref        : (1, TK)       LayerNorm gamma, K-slice
    beta_ref     : (1, TK)       LayerNorm beta,  K-slice
    b_ref        : (1, TN)       bias, N-slice
    x_ref        : (TF, TS, TK)  input block
    wt_ref       : (TK, TN)      W.T block
    o_ref        : (TF, TS, TN)  output block (written at the last K step)
    mu_ref       : (TF, 1)       scratch: LN mean per function
    rstd_ref     : (TF, 1)       scratch: LN 1/sqrt(var + eps) per function
    acc_ref      : (TF*TS, TN)   scratch: f32 accumulator (bias folded in)
    """
    k = pl.program_id(3)
    nk = pl.num_programs(3)
    tf_, ts, tk = x_ref.shape
    tn = o_ref.shape[2]

    @pl.when(k == 0)
    def _init():
        # LayerNorm statistics over the FULL din for all TF functions at once.
        cond_full = jnp.dot(code_ref[...], wct_full_ref[...],
                            preferred_element_type=jnp.float32)        # (TF, din)
        mu = jnp.mean(cond_full, axis=-1, keepdims=True)               # (TF, 1)
        var = jnp.mean(jnp.square(cond_full - mu), axis=-1, keepdims=True)
        mu_ref[...] = mu
        rstd_ref[...] = lax.rsqrt(var + _LN_EPS)
        # Fold the bias add into the accumulator init (saves a VPU pass later).
        acc_ref[...] = jnp.broadcast_to(b_ref[...].astype(jnp.float32),
                                        acc_ref.shape)

    # This K-slice of cond = LN(code.T @ w_c.T)[:, k*TK:(k+1)*TK], recomputed
    # from the BlockSpec-delivered w_c.T slice (cheap: (TF, dcond) x (dcond, TK)).
    cond_k = jnp.dot(code_ref[...], wct_k_ref[...],
                     preferred_element_type=jnp.float32)                # (TF, TK)
    cond_k = (cond_k - mu_ref[...]) * rstd_ref[...]
    cond_k = cond_k * g_ref[...].astype(jnp.float32) + beta_ref[...].astype(jnp.float32)

    # Fuse with x and run one large MXU matmul over the whole (TF*TS) row block.
    fused = x_ref[...].astype(jnp.float32) * cond_k[:, None, :]         # (TF, TS, TK)
    fused = fused.astype(x_ref.dtype)          # bf16 inputs stay bf16 on the MXU
    acc_ref[...] += jnp.dot(fused.reshape(tf_ * ts, tk), wt_ref[...],
                            preferred_element_type=jnp.float32)         # (TF*TS, TN)

    @pl.when(k == nk - 1)
    def _store():
        o_ref[...] = acc_ref[...].reshape(tf_, ts, tn).astype(o_ref.dtype)


def modlin2d(x, code, w_c, W, b, gamma, beta):
    """x: (nf, seq, din); code: (dcond, nf); w_c: (din, dcond); W: (dout, din); b: (dout,)."""
    nf, seq, din = x.shape
    dcond = code.shape[0]
    dout = W.shape[0]

    # ---- layout-only glue (no math hoisted out of the kernel) ----
    code_t = code.T                                      # (nf, dcond)
    wc_t = w_c.T                                         # (dcond, din)
    Wt = W.T                                             # (din, dout)
    dout_p = ((dout + 127) // 128) * 128                 # lane-dense output width
    if dout_p != dout:
        Wt = jnp.pad(Wt, ((0, 0), (0, dout_p - dout)))
        b = jnp.pad(b, (0, dout_p - dout))
    b2 = b.reshape(1, dout_p)
    g2 = gamma.reshape(1, din)
    beta2 = beta.reshape(1, din)

    # ---- tile sizes (caps keep the double-buffered set well under v7x's 64 MiB) ----
    TF = _pick_tile(nf, 8, 8)           # functions per step
    TS = _pick_tile(seq, 256, 8)        # sequence rows per step (sublane-aligned)
    TK = _pick_tile(din, 512, 128)      # reduction (din) tile
    TN = _pick_tile(dout_p, 256, 128)   # output-feature (lane) tile

    grid = (nf // TF, seq // TS, dout_p // TN, din // TK)

    # VMEM budget: double-buffered pipeline tiles + single-buffered scratch.
    isz = x.dtype.itemsize
    est = 2 * (TF * TS * TK * isz                   # x tile
               + TK * TN * Wt.dtype.itemsize        # W.T tile
               + TF * TS * TN * isz                 # out tile
               + (TF * dcond + dcond * din + dcond * TK + 2 * TK + TN) * 4)
    est += (TF * TS * TN + 2 * TF) * 4              # accumulator + LN-stat scratch
    vmem_limit = int(min(60 * 2**20, max(32 * 2**20, 2 * est)))

    out_p = pl.pallas_call(
        modlin2d_kernel,
        out_shape=jax.ShapeDtypeStruct((nf, seq, dout_p), x.dtype),
        grid=grid,
        in_specs=[
            pl.BlockSpec((TF, dcond), lambda f, s, n, k: (f, 0)),      # code.T rows
            pl.BlockSpec((dcond, din), lambda f, s, n, k: (0, 0)),     # w_c.T full (LN stats)
            pl.BlockSpec((dcond, TK), lambda f, s, n, k: (0, k)),      # w_c.T K-slice
            pl.BlockSpec((1, TK), lambda f, s, n, k: (0, k)),          # gamma K-slice
            pl.BlockSpec((1, TK), lambda f, s, n, k: (0, k)),          # beta  K-slice
            pl.BlockSpec((1, TN), lambda f, s, n, k: (0, n)),          # bias  N-slice
            pl.BlockSpec((TF, TS, TK), lambda f, s, n, k: (f, s, k)),  # x block
            pl.BlockSpec((TK, TN), lambda f, s, n, k: (k, n)),         # W.T block
        ],
        out_specs=pl.BlockSpec((TF, TS, TN), lambda f, s, n, k: (f, s, n)),
        scratch_shapes=[
            pltpu.VMEM((TF, 1), jnp.float32),         # LN mean
            pltpu.VMEM((TF, 1), jnp.float32),         # LN rstd
            pltpu.VMEM((TF * TS, TN), jnp.float32),   # f32 accumulator
        ],
        compiler_params=pltpu.CompilerParams(
            dimension_semantics=("parallel", "parallel", "parallel", "arbitrary"),
            vmem_limit_bytes=vmem_limit,
        ),
    )(code_t, wc_t, wc_t, g2, beta2, b2, x, Wt)

    return out_p[..., :dout] if dout_p != dout else out_p


def modlin2d_ref(x, code, w_c, W, b, gamma, beta, eps=_LN_EPS):
    """Pure-JAX reference mirroring the PyTorch forward."""
    cond = (w_c @ code).T                                   # (nf, din)
    mean = jnp.mean(cond, axis=-1, keepdims=True)
    var = jnp.mean(jnp.square(cond - mean), axis=-1, keepdims=True)
    cond = (cond - mean) / jnp.sqrt(var + eps) * gamma + beta
    out = x * cond[:, None, :]                              # (nf, seq, din)
    return out @ W.T + b                                    # (nf, seq, dout)


def _run_case(key, nf, seq, din, dout, dcond):
    kx, kc, kwc, kw, kb, kg, kbe = jax.random.split(key, 7)
    x = jax.random.normal(kx, (nf, seq, din), dtype=jnp.float32)
    code = jax.random.normal(kc, (dcond, nf), dtype=jnp.float32)
    w_c = jax.random.normal(kwc, (din, dcond), dtype=jnp.float32) * 0.1
    W = jax.random.normal(kw, (dout, din), dtype=jnp.float32) * 0.1
    b = jax.random.normal(kb, (dout,), dtype=jnp.float32) * 0.1
    gamma = 1.0 + 0.1 * jax.random.normal(kg, (din,), dtype=jnp.float32)
    beta = 0.1 * jax.random.normal(kbe, (din,), dtype=jnp.float32)

    out = jax.block_until_ready(modlin2d(x, code, w_c, W, b, gamma, beta))
    ref = modlin2d_ref(x, code, w_c, W, b, gamma, beta)
    assert out.shape == (nf, seq, dout)
    assert jnp.allclose(out, ref, atol=2e-4, rtol=2e-4), "mismatch vs reference"


if __name__ == "__main__":
    key = jax.random.PRNGKey(0)
    k1, k2 = jax.random.split(key)

    # Small shapes consistent with the module (exercises the dout->128 lane pad).
    _run_case(k1, nf=8, seq=16, din=32, dout=32, dcond=8)
    # Slightly larger case that exercises the K-tiled accumulator path (din/TK = 2).
    _run_case(k2, nf=8, seq=32, din=1024, dout=256, dcond=16)

    print("KERNEL_OK")
</pallas_src>

<mosaic_0001>
module attributes {stable_mosaic.version = 11 : i64} {
  func.func @modlin2d_kernel(%arg0: i32, %arg1: i32, %arg2: i32, %arg3: i32, %arg4: memref<8x8xf32, #tpu.memory_space<vmem>>, %arg5: memref<8x32xf32, #tpu.memory_space<vmem>>, %arg6: memref<8x32xf32, #tpu.memory_space<vmem>>, %arg7: memref<1x32xf32, #tpu.memory_space<vmem>>, %arg8: memref<1x32xf32, #tpu.memory_space<vmem>>, %arg9: memref<1x128xf32, #tpu.memory_space<vmem>>, %arg10: memref<8x16x32xf32, #tpu.memory_space<vmem>>, %arg11: memref<32x128xf32, #tpu.memory_space<vmem>>, %arg12: memref<8x16x128xf32, #tpu.memory_space<vmem>>, %arg13: memref<8x1xf32, #tpu.memory_space<vmem>>, %arg14: memref<8x1xf32, #tpu.memory_space<vmem>>, %arg15: memref<128x128xf32, #tpu.memory_space<vmem>>) attributes {dimension_semantics = [#tpu.dimension_semantics<parallel>, #tpu.dimension_semantics<parallel>, #tpu.dimension_semantics<parallel>, #tpu.dimension_semantics<arbitrary>], iteration_bounds = array<i64: 1, 1, 1, 1>, scalar_prefetch = 0 : i64, scratch_operands = 3 : i64, tpu.core_type = #tpu.core_type<tc>, window_params = [{transform_indices = @transform_0, window_bounds = array<i64: 8, 8>}, {pipeline_mode = #tpu.pipeline_mode<synchronous>, transform_indices = @transform_1, window_bounds = array<i64: 8, 32>}, {transform_indices = @transform_2, window_bounds = array<i64: 8, 32>}, {transform_indices = @transform_3, window_bounds = array<i64: 1, 32>}, {transform_indices = @transform_4, window_bounds = array<i64: 1, 32>}, {transform_indices = @transform_5, window_bounds = array<i64: 1, 128>}, {transform_indices = @transform_6, window_bounds = array<i64: 8, 16, 32>}, {transform_indices = @transform_7, window_bounds = array<i64: 32, 128>}, {transform_indices = @transform_8, window_bounds = array<i64: 8, 16, 128>}]} {
    %c0_i32 = arith.constant 0 : i32
    %0 = arith.cmpi eq, %arg3, %c0_i32 : i32
    %1 = arith.extui %0 : i1 to i32
    %c0_i32_0 = arith.constant 0 : i32
    %2 = arith.cmpi ne, %1, %c0_i32_0 : i32
    scf.if %2 {
      %c0_24 = arith.constant 0 : index
      %c0_25 = arith.constant 0 : index
      %31 = vector.load %arg4[%c0_24, %c0_25] : memref<8x8xf32, #tpu.memory_space<vmem>>, vector<8x8xf32>
      %c0_26 = arith.constant 0 : index
      %c0_27 = arith.constant 0 : index
      %32 = vector.load %arg5[%c0_26, %c0_27] : memref<8x32xf32, #tpu.memory_space<vmem>>, vector<8x32xf32>
      %cst_28 = arith.constant dense<0.000000e+00> : vector<8x32xf32>
      %33 = tpu.matmul %31, %32, %cst_28 {dimension_numbers = #tpu.dot_dimension_numbers<[1], [0], [0], [1], [0, 0, 1, 1], [], []>} : vector<8x8xf32>, vector<8x32xf32>, vector<8x32xf32> -> vector<8x32xf32>
      %cst_29 = arith.constant dense<0.000000e+00> : vector<8xf32>
      %34 = vector.multi_reduction <add>, %33, %cst_29 [1] : vector<8x32xf32> to vector<8xf32>
      %35 = vector.shape_cast %34 : vector<8xf32> to vector<8x1xf32>
      %cst_30 = arith.constant 3.200000e+01 : f32
      %36 = vector.broadcast %cst_30 : f32 to vector<8x1xf32>
      %37 = arith.divf %35, %36 : vector<8x1xf32>
      %38 = vector.broadcast %37 : vector<8x1xf32> to vector<8x32xf32>
      %39 = arith.subf %33, %38 : vector<8x32xf32>
      %40 = arith.mulf %39, %39 : vector<8x32xf32>
      %cst_31 = arith.constant dense<0.000000e+00> : vector<8xf32>
      %41 = vector.multi_reduction <add>, %40, %cst_31 [1] : vector<8x32xf32> to vector<8xf32>
      %42 = vector.shape_cast %41 : vector<8xf32> to vector<8x1xf32>
      %cst_32 = arith.constant 3.200000e+01 : f32
      %43 = vector.broadcast %cst_32 : f32 to vector<8x1xf32>
      %44 = arith.divf %42, %43 : vector<8x1xf32>
      %c0_33 = arith.constant 0 : index
      %c0_34 = arith.constant 0 : index
      %45 = vector.load %arg13[%c0_33, %c0_34] : memref<8x1xf32, #tpu.memory_space<vmem>>, vector<8x1xf32>
      tpu.vector_store %arg13[%c0_33, %c0_34], %37 {strides = array<i32>} : memref<8x1xf32, #tpu.memory_space<vmem>>, vector<8x1xf32>,
      %cst_35 = arith.constant 9.99999974E-6 : f32
      %46 = vector.broadcast %cst_35 : f32 to vector<8x1xf32>
      %47 = arith.addf %44, %46 : vector<8x1xf32>
      %48 = math.rsqrt %47 : vector<8x1xf32>
      %c0_36 = arith.constant 0 : index
      %c0_37 = arith.constant 0 : index
      %49 = vector.load %arg14[%c0_36, %c0_37] : memref<8x1xf32, #tpu.memory_space<vmem>>, vector<8x1xf32>
      tpu.vector_store %arg14[%c0_36, %c0_37], %48 {strides = array<i32>} : memref<8x1xf32, #tpu.memory_space<vmem>>, vector<8x1xf32>,
      %c0_38 = arith.constant 0 : index
      %c0_39 = arith.constant 0 : index
      %50 = vector.load %arg9[%c0_38, %c0_39] : memref<1x128xf32, #tpu.memory_space<vmem>>, vector<1x128xf32>
      %51 = vector.shape_cast %50 : vector<1x128xf32> to vector<1x128xf32>
      %52 = vector.broadcast %51 : vector<1x128xf32> to vector<128x128xf32>
      %c0_40 = arith.constant 0 : index
      %c0_41 = arith.constant 0 : index
      %53 = vector.load %arg15[%c0_40, %c0_41] : memref<128x128xf32, #tpu.memory_space<vmem>>, vector<128x128xf32>
      tpu.vector_store %arg15[%c0_40, %c0_41], %52 {strides = array<i32>} : memref<128x128xf32, #tpu.memory_space<vmem>>, vector<128x128xf32>,
    } else {
    }
    %c0 = arith.constant 0 : index
    %c0_1 = arith.constant 0 : index
    %3 = vector.load %arg4[%c0, %c0_1] : memref<8x8xf32, #tpu.memory_space<vmem>>, vector<8x8xf32>
    %c0_2 = arith.constant 0 : index
    %c0_3 = arith.constant 0 : index
    %4 = vector.load %arg6[%c0_2, %c0_3] : memref<8x32xf32, #tpu.memory_space<vmem>>, vector<8x32xf32>
    %cst = arith.constant dense<0.000000e+00> : vector<8x32xf32>
    %5 = tpu.matmul %3, %4, %cst {dimension_numbers = #tpu.dot_dimension_numbers<[1], [0], [0], [1], [0, 0, 1, 1], [], []>} : vector<8x8xf32>, vector<8x32xf32>, vector<8x32xf32> -> vector<8x32xf32>
    %c0_4 = arith.constant 0 : index
    %c0_5 = arith.constant 0 : index
    %6 = vector.load %arg13[%c0_4, %c0_5] : memref<8x1xf32, #tpu.memory_space<vmem>>, vector<8x1xf32>
    %7 = vector.broadcast %6 : vector<8x1xf32> to vector<8x32xf32>
    %8 = arith.subf %5, %7 : vector<8x32xf32>
    %c0_6 = arith.constant 0 : index
    %c0_7 = arith.constant 0 : index
    %9 = vector.load %arg14[%c0_6, %c0_7] : memref<8x1xf32, #tpu.memory_space<vmem>>, vector<8x1xf32>
    %10 = vector.broadcast %9 : vector<8x1xf32> to vector<8x32xf32>
    %11 = arith.mulf %8, %10 : vector<8x32xf32>
    %c0_8 = arith.constant 0 : index
    %c0_9 = arith.constant 0 : index
    %12 = vector.load %arg7[%c0_8, %c0_9] : memref<1x32xf32, #tpu.memory_space<vmem>>, vector<1x32xf32>
    %13 = vector.broadcast %12 : vector<1x32xf32> to vector<8x32xf32>
    %14 = arith.mulf %11, %13 : vector<8x32xf32>
    %c0_10 = arith.constant 0 : index
    %c0_11 = arith.constant 0 : index
    %15 = vector.load %arg8[%c0_10, %c0_11] : memref<1x32xf32, #tpu.memory_space<vmem>>, vector<1x32xf32>
    %16 = vector.broadcast %15 : vector<1x32xf32> to vector<8x32xf32>
    %17 = arith.addf %14, %16 : vector<8x32xf32>
    %c0_12 = arith.constant 0 : index
    %c0_13 = arith.constant 0 : index
    %c0_14 = arith.constant 0 : index
    %18 = vector.load %arg10[%c0_12, %c0_13, %c0_14] : memref<8x16x32xf32, #tpu.memory_space<vmem>>, vector<8x16x32xf32>
    %19 = vector.shape_cast %17 : vector<8x32xf32> to vector<8x1x32xf32>
    %20 = vector.broadcast %19 : vector<8x1x32xf32> to vector<8x16x32xf32>
    %21 = arith.mulf %18, %20 : vector<8x16x32xf32>
    %c0_15 = arith.constant 0 : index
    %c0_16 = arith.constant 0 : index
    %22 = vector.load %arg15[%c0_15, %c0_16] : memref<128x128xf32, #tpu.memory_space<vmem>>, vector<128x128xf32>
    %23 = vector.shape_cast %21 : vector<8x16x32xf32> to vector<128x32xf32>
    %c0_17 = arith.constant 0 : index
    %c0_18 = arith.constant 0 : index
    %24 = vector.load %arg11[%c0_17, %c0_18] : memref<32x128xf32, #tpu.memory_space<vmem>>, vector<32x128xf32>
    %cst_19 = arith.constant dense<0.000000e+00> : vector<128x128xf32>
    %25 = tpu.matmul %23, %24, %cst_19 {dimension_numbers = #tpu.dot_dimension_numbers<[1], [0], [0], [1], [0, 0, 1, 1], [], []>} : vector<128x32xf32>, vector<32x128xf32>, vector<128x128xf32> -> vector<128x128xf32>
    %26 = arith.addf %22, %25 : vector<128x128xf32>
    %c0_20 = arith.constant 0 : index
    %c0_21 = arith.constant 0 : index
    %27 = vector.load %arg15[%c0_20, %c0_21] : memref<128x128xf32, #tpu.memory_space<vmem>>, vector<128x128xf32>
    tpu.vector_store %arg15[%c0_20, %c0_21], %26 {strides = array<i32>} : memref<128x128xf32, #tpu.memory_space<vmem>>, vector<128x128xf32>,
    %c0_i32_22 = arith.constant 0 : i32
    %28 = arith.cmpi eq, %arg3, %c0_i32_22 : i32
    %29 = arith.extui %28 : i1 to i32
    %c0_i32_23 = arith.constant 0 : i32
    %30 = arith.cmpi ne, %29, %c0_i32_23 : i32
    scf.if %30 {
      %c0_24 = arith.constant 0 : index
      %c0_25 = arith.constant 0 : index
      %31 = vector.load %arg15[%c0_24, %c0_25] : memref<128x128xf32, #tpu.memory_space<vmem>>, vector<128x128xf32>
      %32 = vector.shape_cast %31 : vector<128x128xf32> to vector<8x16x128xf32>
      %c0_26 = arith.constant 0 : index
      %c0_27 = arith.constant 0 : index
      %c0_28 = arith.constant 0 : index
      %33 = vector.load %arg12[%c0_26, %c0_27, %c0_28] : memref<8x16x128xf32, #tpu.memory_space<vmem>>, vector<8x16x128xf32>
      tpu.vector_store %arg12[%c0_26, %c0_27, %c0_28], %32 {strides = array<i32>} : memref<8x16x128xf32, #tpu.memory_space<vmem>>, vector<8x16x128xf32>,
    } else {
    }
    return
  }
  func.func @transform_0(%arg0: i32, %arg1: i32, %arg2: i32, %arg3: i32) -> (i32, i32) {
    %c0_i32 = arith.constant 0 : i32
    %c0_i32_0 = arith.constant 0 : i32
    return %arg0, %c0_i32 : i32, i32
  }
  func.func @transform_1(%arg0: i32, %arg1: i32, %arg2: i32, %arg3: i32) -> (i32, i32) {
    %c0_i32 = arith.constant 0 : i32
    %c0_i32_0 = arith.constant 0 : i32
    %c0_i32_1 = arith.constant 0 : i32
    return %c0_i32, %c0_i32_0 : i32, i32
  }
  func.func @transform_2(%arg0: i32, %arg1: i32, %arg2: i32, %arg3: i32) -> (i32, i32) {
    %c0_i32 = arith.constant 0 : i32
    %c0_i32_0 = arith.constant 0 : i32
    return %c0_i32, %arg3 : i32, i32
  }
  func.func @transform_3(%arg0: i32, %arg1: i32, %arg2: i32, %arg3: i32) -> (i32, i32) {
    %c0_i32 = arith.constant 0 : i32
    %c0_i32_0 = arith.constant 0 : i32
    return %c0_i32, %arg3 : i32, i32
  }
  func.func @transform_4(%arg0: i32, %arg1: i32, %arg2: i32, %arg3: i32) -> (i32, i32) {
    %c0_i32 = arith.constant 0 : i32
    %c0_i32_0 = arith.constant 0 : i32
    return %c0_i32, %arg3 : i32, i32
  }
  func.func @transform_5(%arg0: i32, %arg1: i32, %arg2: i32, %arg3: i32) -> (i32, i32) {
    %c0_i32 = arith.constant 0 : i32
    %c0_i32_0 = arith.constant 0 : i32
    return %c0_i32, %arg2 : i32, i32
  }
  func.func @transform_6(%arg0: i32, %arg1: i32, %arg2: i32, %arg3: i32) -> (i32, i32, i32) {
    %c0_i32 = arith.constant 0 : i32
    return %arg0, %arg1, %arg3 : i32, i32, i32
  }
  func.func @transform_7(%arg0: i32, %arg1: i32, %arg2: i32, %arg3: i32) -> (i32, i32) {
    %c0_i32 = arith.constant 0 : i32
    return %arg3, %arg2 : i32, i32
  }
  func.func @transform_8(%arg0: i32, %arg1: i32, %arg2: i32, %arg3: i32) -> (i32, i32, i32) {
    %c0_i32 = arith.constant 0 : i32
    return %arg0, %arg1, %arg2 : i32, i32, i32
  }
}

</mosaic_0001>

<bundles_post_ra>
// kernel: tpu_custom_call.1
= control target key start
LH: loop header
LB: loop body
LE: loop exit
PB: predicated region body
PF: predicated region fallthrough
CT: control target
= control target key end

     0   :  { %13 = vsyncpa [#allocation6], 0  ;;  %s1167_s0 = inlined_call_operand.hbm [shape: f32[8,8], index: 0, kind: input, shape index: {}]   ;;  %s1168_s1 = inlined_call_operand.hbm [shape: f32[8,32], index: 1, kind: input, shape index: {}]   ;;  %s1169_s2 = inlined_call_operand.hbm [shape: f32[8,32], index: 2, kind: input, shape index: {}]   ;;  %s1170_s3 = inlined_call_operand.vmem [shape: f32[1,32], index: 3, kind: input, shape index: {}]   ;;  %s1171_s4 = inlined_call_operand.vmem [shape: f32[1,32], index: 4, kind: input, shape index: {}]   ;;  %s1172_s5 = inlined_call_operand.vmem [shape: f32[1,128], index: 5, kind: input, shape index: {}]   ;;  %s1173_s6 = inlined_call_operand.hbm [shape: f32[8,16,32], index: 6, kind: input, shape index: {}]   ;;  %s1174_s7 = inlined_call_operand.hbm [shape: f32[32,128], index: 7, kind: input, shape index: {}]   ;;  %s1175_s8 = inlined_call_operand.hbm [shape: f32[8,16,128], index: 8, kind: output, shape index: {}]  }
   0x1   :  { %14 = vsyncpa [#allocation9], 0 }
   0x2   :  { %15 = vsyncpa [#allocation12], 0 }
   0x3   :  { %16 = vsyncpa [#allocation7], 0  ;;  %s995_s27 = smov [#allocation8]   ;;  %s996_s29 = smov [#allocation11]  }
   0x4   :  { %s33_s28 = sshll.u32 %s995_s27, 4  ;;  %s58_s30 = sshll.u32 %s996_s29, 4  ;;  %s34_s28 = int_to_ptr.vmem [resolvable:$true] %s33_s28  ;;  %s1052_s30 = int_to_ptr.vmem [resolvable:$true] %s58_s30 }
   0x5   :  { %s855_s11 = scalar_lea.hbm %s1168_s1, 128 }
   0x6   :  { %p856_p0 = scmp.ne.s32.totalorder %s1168_s1, %s855_s11  ;;  %p859_p1 = scmp.lt.u32.totalorder %s855_s11, %s1168_s1 }
   0x8   :  { %p861_p2 = pnand %p859_p1, %p856_p0 }
   0xa   :  { %864 = shalt.err (!%p861_p2)
}
   0xb   :  { %s865_s16 = scalar_lea.vmem %s34_s28, 128  ;;  %p870_p4 = scmp.lt.s32.totalorder %s34_s28, %s34_s28 }
   0xc   :  { %p866_p3 = scmp.ne.s32.totalorder %s34_s28, %s865_s16  ;;  %p871_p5 = scmp.lt.s32.totalorder %s865_s16, %s865_s16 }
   0xe   :  { %p872_p6 = por %p871_p5, %p870_p4 }
  0x10   :  { %p873_p7 = pnand %p872_p6, %p866_p3 }
  0x12   :  { %876 = shalt.err (!%p873_p7)
}
  0x13   :  { %36 = dma.hbm_to_vmem [thread:$0]  %s1168_s1, 128, %s34_s28, [#allocation9]  }
  0x14   :  { %s877_s21 = scalar_lea.hbm %s1173_s6, 2048 }
  0x15   :  { %p878_p8 = scmp.ne.s32.totalorder %s1173_s6, %s877_s21  ;;  %p881_p9 = scmp.lt.u32.totalorder %s877_s21, %s1173_s6 }
  0x17   :  { %p883_p10 = pnand %p881_p9, %p878_p8 }
  0x19   :  { %886 = shalt.err (!%p883_p10)
}
  0x1a   :  { %s887_s26 = scalar_lea.vmem %s1052_s30, 2048  ;;  %p892_p12 = scmp.lt.s32.totalorder %s1052_s30, %s1052_s30 }
  0x1b   :  { %p888_p11 = scmp.ne.s32.totalorder %s1052_s30, %s887_s26  ;;  %p893_p13 = scmp.lt.s32.totalorder %s887_s26, %s887_s26 }
  0x1d   :  { %p894_p0 = por %p893_p13, %p892_p12 }
  0x1f   :  { %p895_p1 = pnand %p894_p0, %p888_p11 }
  0x21   :  { %898 = shalt.err (!%p895_p1)
}
  0x22   :  { %s997_s1 = smov 128   ;;  %s998_s27 = smov 8  }
  0x23   :  { %64 = dma.hbm_to_vmem [thread:$0]  %s1173_s6, 2048, %s1052_s30, [#allocation12], %s997_s1, %s997_s1, %s998_s27  }
  0x24   :  { %s999_s9 = smov [#allocation5]   ;;  %s1000_s11 = smov [#allocation10]  }
  0x25   :  { %s23_s10 = sshll.u32 %s999_s9, 4  ;;  %s43_s12 = sshll.u32 %s1000_s11, 4  ;;  %s24_s10 = int_to_ptr.vmem [resolvable:$true] %s23_s10  ;;  %s44_s12 = int_to_ptr.vmem [resolvable:$true] %s43_s12 }
  0x26   :  { %s899_s15 = scalar_lea.hbm %s1167_s0, 128 }
  0x27   :  { %p900_p2 = scmp.ne.s32.totalorder %s1167_s0, %s899_s15  ;;  %p903_p3 = scmp.lt.u32.totalorder %s899_s15, %s1167_s0 }
  0x29   :  { %p905_p4 = pnand %p903_p3, %p900_p2 }
  0x2b   :  { %908 = shalt.err (!%p905_p4)
}
  0x2c   :  { %s909_s6 = scalar_lea.vmem %s24_s10, 128  ;;  %p914_p6 = scmp.lt.s32.totalorder %s24_s10, %s24_s10 }
  0x2d   :  { %p910_p5 = scmp.ne.s32.totalorder %s24_s10, %s909_s6  ;;  %p915_p7 = scmp.lt.s32.totalorder %s909_s6, %s909_s6 }
  0x2f   :  { %p916_p8 = por %p915_p7, %p914_p6 }
  0x31   :  { %p917_p9 = pnand %p916_p8, %p910_p5 }
  0x33   :  { %920 = shalt.err (!%p917_p9)
}
  0x34   :  { %26 = dma.hbm_to_vmem [thread:$0]  %s1167_s0, 128, %s24_s10, [#allocation6]  }
  0x35   :  { %s921_s23 = scalar_lea.hbm %s1169_s2, 128 }
  0x36   :  { %p922_p10 = scmp.ne.s32.totalorder %s1169_s2, %s921_s23  ;;  %p925_p11 = scmp.lt.u32.totalorder %s921_s23, %s1169_s2 }
  0x38   :  { %p927_p12 = pnand %p925_p11, %p922_p10 }
  0x3a   :  { %930 = shalt.err (!%p927_p12)
}
  0x3b   :  { %s931_s29 = scalar_lea.vmem %s44_s12, 128  ;;  %p936_p0 = scmp.lt.s32.totalorder %s44_s12, %s44_s12 }
  0x3c   :  { %p932_p13 = scmp.ne.s32.totalorder %s44_s12, %s931_s29  ;;  %p937_p1 = scmp.lt.s32.totalorder %s931_s29, %s931_s29 }
  0x3e   :  { %p938_p2 = por %p937_p1, %p936_p0 }
  0x40   :  { %p939_p3 = pnand %p938_p2, %p932_p13 }
  0x42   :  { %942 = shalt.err (!%p939_p3)
}
  0x43   :  { %46 = dma.hbm_to_vmem [thread:$0]  %s1169_s2, 128, %s44_s12, [#allocation9]  }
  0x44   :  { %s1001_s10 = smov [#allocation13]   ;;  %s943_s15 = scalar_lea.hbm %s1174_s7, 512 }
  0x45   :  { %s70_s11 = sshll.u32 %s1001_s10, 4  ;;  %p944_p4 = scmp.ne.s32.totalorder %s1174_s7, %s943_s15  ;;  %s71_s11 = int_to_ptr.vmem [resolvable:$true] %s70_s11 }
  0x46   :  { %p947_p5 = scmp.lt.u32.totalorder %s943_s15, %s1174_s7 }
  0x48   :  { %p949_p6 = pnand %p947_p5, %p944_p4 }
  0x4a   :  { %952 = shalt.err (!%p949_p6)
}
  0x4b   :  { %s953_s6 = scalar_lea.vmem %s71_s11, 512  ;;  %p958_p8 = scmp.lt.s32.totalorder %s71_s11, %s71_s11 }
  0x4c   :  { %p954_p7 = scmp.ne.s32.totalorder %s71_s11, %s953_s6  ;;  %p959_p9 = scmp.lt.s32.totalorder %s953_s6, %s953_s6 }
  0x4e   :  { %p960_p10 = por %p959_p9, %p958_p8 }
  0x50   :  { %p961_p11 = pnand %p960_p10, %p954_p7 }
  0x52   :  { %964 = shalt.err (!%p961_p11)
}
  0x53   :  { %76 = dma.hbm_to_vmem [thread:$0]  %s1174_s7, 512, %s71_s11, [#allocation12], %s997_s1, %s997_s1, %s998_s27  }
  0x54   :  { %987 = dma.done.wait [#allocation6], 128  }
  0x55   :  { %988 = vsyncadd [#allocation6], 4294967168 }
  0x56   :  { %989 = dma.done.wait [#allocation9], 256  }
  0x57   :  { %990 = vsyncadd [#allocation9], 4294967040 }
  0x58   :  { %991 = dma.done.wait [#allocation12], 2560  }
  0x59   :  { %992 = vsyncadd [#allocation12], 4294964736  ;;  %v1002_v0 = vmov 0.0   ;;  %vm1003_vm0 = vmmov 0   ;;  %vm98_vm1 = vcmask 64512   ;;  %v97_v1 = vld [vmem:[#allocation8] sm:$0xff]  ;;  %v339_v29 = vlaneseq }
  0x5a   :  { %785 = vmatprep.subr.mxu0 %v1002_v0  ;;  %787 = vmatprep.mubr.msk.f32.mxu0 %vm1003_vm0, %v1002_v0  ;;  %v96_v2 = vld [vmem:[#allocation5] sm:$0xff]  ;;  %v213_v3 = vld [vmem:[#allocation10] sm:$0xff]  ;;  %vm172_vm2 = vcmask 261120   ;;  %v1004_v7 = vmov 0   ;;  %vm184_vm3 = vcmask 7168   ;;  %v456_v21 = vld [vmem:[#allocation13] sm:$0xff] }
  0x5b   :  { %790 = vmatprep.subr.mxu1 %v1002_v0  ;;  %792 = vmatprep.mubr.msk.f32.mxu1 %vm1003_vm0, %v1002_v0  ;;  %v457_v22 = vld [vmem:[#allocation13 + $0x8] sm:$0xff]  ;;  %v458_v24 = vld [vmem:[#allocation13 + $0x10] sm:$0xff]  ;;  %v459_v25 = vld [vmem:[#allocation13 + $0x18] sm:$0xff]  ;;  %v1005_v27 = vmov 1966171168   ;;  %v340_v33 = vshrl.u32 %v339_v29, 7 }
  0x5c   :  { %786 = vmatpush3.msra.mxu0 %v97_v1  ;;  %791 = vmatpush3.msra.mxu1 %v213_v3  ;;  %v827_v23 = vpack.c.bf16 %v457_v22, %v456_v21  ;;  %v831_v26 = vpack.c.bf16 %v459_v25, %v458_v24  ;;  %v337_v28 = vunpack.c.l.s4 %v1005_v27  ;;  %v743_v34 = vld [vmem:[%s1170_s3] ss:$0 sm:$0xff]  ;;  %v318_v50 = vld [vmem:[#allocation11] sm:$0xff]  ;;  %v319_v51 = vld [vmem:[#allocation11 + $0x8] sm:$0xff] }
  0x5d   :  { %788 = vmatmul.mubr.msk.f32.vlgmr.msra.gmra.mrb[0].mxu0 %vm98_vm1, %v96_v2  ;;  %793 = vmatmul.mubr.msk.f32.vlgmr.msra.gmra.mrb[0].mxu1 %vm98_vm1, %v96_v2  ;;  %v744_v37 = vld [vmem:[%s1171_s4] ss:$0 sm:$0xff]  ;;  %v386_v43 = vsub.s32 0, %v340_v33  ;;  %v320_v54 = vld [vmem:[#allocation11 + $0x10] sm:$0xff]  ;;  %v326_v55 = vld [vmem:[#allocation11 + $0x40] sm:$0xff] }
  0x5e   :  { %851 = vset.pattern.permute.xlu1 %v1004_v7  ;;  %852 = vset.pattern.permute.xlu0 %v1004_v7  ;;  %v338_v32 = vunpack.c.0.s8 %v337_v28  ;;  %v327_v56 = vld [vmem:[#allocation11 + $0x48] sm:$0xff]  ;;  %v328_v62 = vld [vmem:[#allocation11 + $0x50] sm:$0xff]  ;;  %v333_v28 = vld [vmem:[#allocation11 + $0x78] sm:$0xff] }
  0x5f   :  { %828 = vmatprep.subr.bf16.mxu0 %v827_v23  ;;  %835 = vmatprep.subr.bf16.mxu1 %v827_v23  ;;  %v332_v22 = vld [vmem:[#allocation11 + $0x70] sm:$0xff] }
  0x60   :  { %830 = vmatpush3.bf16.msra.mxu0 %v827_v23  ;;  %837 = vmatpush3.bf16.msra.mxu1 %v827_v23  ;;  %v341_v38 = vsub.s32 %v338_v32, %v340_v33 }
  0x61   :  { %832 = vmatprep.subr.bf16.mxu0 %v831_v26  ;;  %836 = vmatprep.subr.bf16.mxu1 %v831_v26 }
  0x64   :  { %834 = vmatpush3.bf16.msra.mxu0 %v831_v26  ;;  %838 = vmatpush3.bf16.msra.mxu1 %v831_v26  ;;  %v325_v26 = vld [vmem:[#allocation11 + $0x38] sm:$0xff] }
 0x130   :  { %v168_v4 = vpop.f32.mrb[0].mxu0  ;;  %v284_v8 = vpop.f32.mrb[0].mxu1 }
 0x131   :  { %v789_v5 = vpop.f32.mrb[1].mxu0  ;;  %v173_v6 = vsel %vm172_vm2, %v168_v4, 0.0  ;;  %v794_v9 = vpop.f32.mrb[1].mxu1 }
 0x132   :  { %174 = vadd.xlane.f32.xlu0 %v173_v6  ;;  %v329_v9 = vld [vmem:[#allocation11 + $0x58] sm:$0xff] }
 0x1bf   :  { %v175_v10 = vpop.xlane.xlu0 %174 }
 0x1c0   :  { %v177_v11 = vmul.f32 0.03125, %v175_v10 }
 0x1c2   :  { %v178_v12 = vsub.f32 %v168_v4, %v177_v11  ;;  %185 = vst.msk [vmem:[#allocation2] sm:$0xff] %vm184_vm3, %v177_v11  ;;  %v321_v4 = vld [vmem:[#allocation11 + $0x18] sm:$0xff]  ;;  %v330_v11 = vld [vmem:[#allocation11 + $0x60] sm:$0xff] }
 0x1c4   :  { %v179_v13 = vmul.f32 %v178_v12, %v178_v12 }
 0x1c6   :  { %v180_v14 = vsel %vm172_vm2, %v179_v13, 0.0 }
 0x1c7   :  { %181 = vadd.xlane.f32.xlu0 %v180_v14 }
 0x1c9   :  { %v288_v15 = vld [vmem:[#allocation2] sm:$0xff] }
 0x1ca   :  { %291 = vperm.xlu1 %851, %v288_v15  }
 0x249   :  { %v292_v30 = vpop.permute.xlu1 %291 }
 0x24a   :  { %v294_v31 = vsub.f32 %v284_v8, %v292_v30  ;;  %v322_v8 = vld [vmem:[#allocation11 + $0x20] sm:$0xff] }
 0x254   :  { %v182_v16 = vpop.xlane.xlu0 %181 }
 0x255   :  { %v183_v17 = vmul.f32 0.03125, %v182_v16  ;;  %v323_v16 = vld [vmem:[#allocation11 + $0x28] sm:$0xff] }
 0x257   :  { %v186_v18 = vadd.f32 1e-05, %v183_v17 }
 0x259   :  { %853 = vrsqrt.f32 %v186_v18 }
 0x263   :  { %v854_v19 = vpop.eup %853 }
 0x264   :  { %188 = vst.msk [vmem:[#allocation3] sm:$0xff] %vm184_vm3, %v854_v19  ;;  %v324_v19 = vld [vmem:[#allocation11 + $0x30] sm:$0xff] }
 0x26b   :  { %v295_v20 = vld [vmem:[#allocation3] sm:$0xff] }
 0x26c   :  { %298 = vperm.xlu1 %851, %v295_v20   ;;  %v331_v20 = vld [vmem:[#allocation11 + $0x68] sm:$0xff] }
 0x2eb   :  { %v299_v35 = vpop.permute.xlu1 %298 }
 0x2ec   :  { %v301_v36 = vmul.f32 %v299_v35, %v294_v31  ;;  %v741_v31 = vld [vmem:[%s1172_s5] ss:$0 sm:$0xff]  ;;  %s1006_s5 = smov [#allocation14]  }
 0x2ed   :  { %s726_s22 = sshll.u32 %s1006_s5, 4  ;;  %s727_s22 = int_to_ptr.vmem [resolvable:$true] %s726_s22 }
 0x2ee   :  { %v309_v39 = vmul.f32 %v743_v34, %v301_v36  ;;  %s965_s23 = scalar_lea.vmem %s727_s22, 2048  ;;  %p970_p13 = scmp.lt.s32.totalorder %s727_s22, %s727_s22 }
 0x2ef   :  { %p966_p12 = scmp.ne.s32.totalorder %s727_s22, %s965_s23  ;;  %p971_p0 = scmp.lt.s32.totalorder %s965_s23, %s965_s23 }
 0x2f0   :  { %v317_v40 = vadd.f32 %v744_v37, %v309_v39 }
 0x2f1   :  { %p972_p1 = por %p971_p0, %p970_p13 }
 0x2f2   :  { %v335_v41 = vcombine.high %v317_v40, %v317_v40  ;;  %v342_v42 = vrot.slane %v317_v40, %v341_v38 }
 0x2f3   :  { %p973_p2 = pnand %p972_p1, %p966_p12 }
 0x2f4   :  { %v349_v44 = vrot.slane %v335_v41, %v341_v38  ;;  %v350_v45 = vcombine.high %v342_v42, %v342_v42  ;;  %v358_v46 = vrot.slane %v342_v42, %v341_v38 }
 0x2f6   :  { %v351_v47 = vcombine.high %v349_v44, %v349_v44  ;;  %v365_v48 = vrot.slane %v349_v44, %v341_v38  ;;  %v372_v49 = vrot.slane %v350_v45, %v341_v38  ;;  %v380_v52 = vcombine.high %v358_v46, %v358_v46 }
 0x2f7   :  { %v387_v53 = vrot.slane %v358_v46, %v386_v43 }
 0x2f8   :  { %v391_v57 = vrot.slane %v372_v49, %v386_v43  ;;  %v403_v58 = vrot.slane %v365_v48, %v386_v43  ;;  %v379_v59 = vrot.slane %v351_v47, %v341_v38  ;;  %v381_v63 = vcombine.high %v365_v48, %v365_v48 }
 0x2f9   :  { %v424_v60 = vmul.f32 %v387_v53, %v318_v50  ;;  %v425_v61 = vmul.f32 %v387_v53, %v319_v51  ;;  %v395_v5 = vrot.slane %v380_v52, %v386_v43  ;;  %v382_v6 = vcombine.high %v372_v49, %v372_v49 }
 0x2fa   :  { %v426_v0 = vmul.f32 %v391_v57, %v320_v54  ;;  %v432_v1 = vmul.f32 %v403_v58, %v326_v55  ;;  %v433_v2 = vmul.f32 %v403_v58, %v327_v56  ;;  %v407_v3 = vrot.slane %v379_v59, %v386_v43 }
 0x2fb   :  { %803 = vmatprep.mubr.msk.f32.mxu0 %vm172_vm2, %v424_v60  ;;  %v411_v10 = vrot.slane %v381_v63, %v386_v43  ;;  %v383_v12 = vcombine.high %v379_v59, %v379_v59  ;;  %v427_v13 = vmul.f32 %v391_v57, %v321_v4  ;;  %v428_v14 = vmul.f32 %v395_v5, %v322_v8 }
 0x2fc   :  { %804 = vmatmul.mubr.msk.f32.vlgmr.msra.gmra.mrb[2].mxu0 %vm172_vm2, %v425_v61  ;;  %815 = vmatprep.mubr.msk.f32.mxu1 %vm172_vm2, %v432_v1  ;;  %v434_v7 = vmul.f32 %v407_v3, %v328_v62  ;;  %v435_v15 = vmul.f32 %v407_v3, %v329_v9  ;;  %v399_v17 = vrot.slane %v382_v6, %v386_v43 }
 0x2fd   :  { %806 = vmatprep.mubr.msk.f32.mxu0 %vm172_vm2, %v426_v0  ;;  %816 = vmatmul.mubr.msk.f32.vlgmr.msra.gmra.mrb[2].mxu1 %vm172_vm2, %v433_v2  ;;  %v436_v18 = vmul.f32 %v411_v10, %v330_v11  ;;  %v415_v21 = vrot.slane %v383_v12, %v386_v43  ;;  %v429_v23 = vmul.f32 %v395_v5, %v323_v16 }
 0x2fe   :  { %818 = vmatprep.mubr.msk.f32.mxu1 %vm172_vm2, %v434_v7  ;;  %v430_v24 = vmul.f32 %v399_v17, %v324_v19  ;;  %v437_v25 = vmul.f32 %v411_v10, %v331_v20  ;;  %v431_v29 = vmul.f32 %v399_v17, %v325_v26 }
 0x2ff   :  { %v438_v27 = vmul.f32 %v415_v21, %v332_v22  ;;  %v439_v30 = vmul.f32 %v415_v21, %v333_v28 }
 0x300   :  { %807 = vmatmul.mubr.msk.f32.gmra.mrb[4].mxu0 %vm172_vm2, %v427_v13 }
 0x301   :  { %809 = vmatprep.mubr.msk.f32.mxu0 %vm172_vm2, %v428_v14  ;;  %819 = vmatmul.mubr.msk.f32.gmra.mrb[4].mxu1 %vm172_vm2, %v435_v15 }
 0x302   :  { %821 = vmatprep.mubr.msk.f32.mxu1 %vm172_vm2, %v436_v18 }
 0x304   :  { %810 = vmatmul.mubr.msk.f32.gmra.mrb[6].mxu0 %vm172_vm2, %v429_v23 }
 0x305   :  { %812 = vmatprep.mubr.msk.f32.mxu0 %vm172_vm2, %v430_v24  ;;  %822 = vmatmul.mubr.msk.f32.gmra.mrb[6].mxu1 %vm172_vm2, %v437_v25 }
 0x306   :  { %824 = vmatprep.mubr.msk.f32.mxu1 %vm172_vm2, %v438_v27 }
 0x308   :  { %813 = vmatmul.mubr.msk.f32.gmra.mrb[8].mxu0 %vm172_vm2, %v431_v29 }
 0x309   :  { %825 = vmatmul.mubr.msk.f32.gmra.mrb[8].mxu1 %vm172_vm2, %v439_v30 }
 0x3cf   :  { %v805_v32 = vpop.f32.mrb[2].mxu0 }
 0x3d0   :  { %v655_v33 = vadd.f32 %v805_v32, %v741_v31  ;;  %v575_v34 = vpop.f32.mrb[3].mxu0  ;;  %v817_v35 = vpop.f32.mrb[2].mxu1 }
 0x3d1   :  { %v654_v36 = vadd.f32 %v741_v31, %v575_v34  ;;  %v663_v37 = vadd.f32 %v817_v35, %v741_v31  ;;  %v615_v38 = vpop.f32.mrb[3].mxu1 }
 0x3d2   :  { %706 = vst [vmem:[#allocation14 + $0x8] sm:$0xff] %v655_v33  ;;  %v662_v39 = vadd.f32 %v741_v31, %v615_v38 }
 0x3d3   :  { %705 = vst [vmem:[#allocation14] sm:$0xff] %v654_v36  ;;  %714 = vst [vmem:[#allocation14 + $0x48] sm:$0xff] %v663_v37  ;;  %v808_v40 = vpop.f32.mrb[4].mxu0 }
 0x3d4   :  { %713 = vst [vmem:[#allocation14 + $0x40] sm:$0xff] %v662_v39  ;;  %v657_v41 = vadd.f32 %v808_v40, %v741_v31  ;;  %v585_v42 = vpop.f32.mrb[5].mxu0  ;;  %v820_v43 = vpop.f32.mrb[4].mxu1 }
 0x3d5   :  { %v656_v44 = vadd.f32 %v741_v31, %v585_v42  ;;  %v665_v45 = vadd.f32 %v820_v43, %v741_v31  ;;  %v625_v46 = vpop.f32.mrb[5].mxu1 }
 0x3d6   :  { %708 = vst [vmem:[#allocation14 + $0x18] sm:$0xff] %v657_v41  ;;  %v664_v47 = vadd.f32 %v741_v31, %v625_v46 }
 0x3d7   :  { %707 = vst [vmem:[#allocation14 + $0x10] sm:$0xff] %v656_v44  ;;  %716 = vst [vmem:[#allocation14 + $0x58] sm:$0xff] %v665_v45  ;;  %v811_v48 = vpop.f32.mrb[6].mxu0 }
 0x3d8   :  { %715 = vst [vmem:[#allocation14 + $0x50] sm:$0xff] %v664_v47  ;;  %v659_v49 = vadd.f32 %v811_v48, %v741_v31  ;;  %v595_v50 = vpop.f32.mrb[7].mxu0  ;;  %v823_v51 = vpop.f32.mrb[6].mxu1 }
 0x3d9   :  { %v658_v52 = vadd.f32 %v741_v31, %v595_v50  ;;  %v667_v53 = vadd.f32 %v823_v51, %v741_v31  ;;  %v635_v54 = vpop.f32.mrb[7].mxu1 }
 0x3da   :  { %710 = vst [vmem:[#allocation14 + $0x28] sm:$0xff] %v659_v49  ;;  %v666_v55 = vadd.f32 %v741_v31, %v635_v54 }
 0x3db   :  { %709 = vst [vmem:[#allocation14 + $0x20] sm:$0xff] %v658_v52  ;;  %718 = vst [vmem:[#allocation14 + $0x68] sm:$0xff] %v667_v53  ;;  %v814_v56 = vpop.f32.mrb[8].mxu0 }
 0x3dc   :  { %717 = vst [vmem:[#allocation14 + $0x60] sm:$0xff] %v666_v55  ;;  %v661_v57 = vadd.f32 %v814_v56, %v741_v31  ;;  %v605_v58 = vpop.f32.mrb[9].mxu0  ;;  %v826_v59 = vpop.f32.mrb[8].mxu1 }
 0x3dd   :  { %v660_v60 = vadd.f32 %v741_v31, %v605_v58  ;;  %v669_v61 = vadd.f32 %v826_v59, %v741_v31  ;;  %v645_v62 = vpop.f32.mrb[9].mxu1 }
 0x3de   :  { %712 = vst [vmem:[#allocation14 + $0x38] sm:$0xff] %v661_v57  ;;  %v668_v63 = vadd.f32 %v741_v31, %v645_v62 }
 0x3df   :  { %711 = vst [vmem:[#allocation14 + $0x30] sm:$0xff] %v660_v60  ;;  %720 = vst [vmem:[#allocation14 + $0x78] sm:$0xff] %v669_v61 }
 0x3e0   :  { %719 = vst [vmem:[#allocation14 + $0x70] sm:$0xff] %v668_v63 }
 0x3e1   :  { %976 = shalt.err (!%p973_p2)
}
 0x3e2   :  { %s977_s26 = scalar_lea.hbm %s1175_s8, 2048 }
 0x3e3   :  { %p978_p3 = scmp.ne.s32.totalorder %s1175_s8, %s977_s26  ;;  %p981_p4 = scmp.lt.u32.totalorder %s977_s26, %s1175_s8 }
 0x3e5   :  { %p983_p5 = pnand %p981_p4, %p978_p3 }
 0x3e7   :  { %986 = shalt.err (!%p983_p5)
}
 0x3e8   :  { %732 = dma.vmem_to_hbm [thread:$0]  %s727_s22, 2048, %s1175_s8, [#allocation7], %s997_s1, %s997_s1, %s998_s27  }
 0x3e9   :  { %993 = dma.done.wait [#allocation7], 2048  }
 0x3ea   :  { %994 = vsyncadd [#allocation7], 4294965248 }
 0x3eb   :  { %736 = vsyncpa [#allocation6], 1 }
 0x3ec   :  { %737 = vsyncpa [#allocation9], 1 }
 0x3ed   :  { %738 = vsyncpa [#allocation12], 1 }
 0x3ee   :  { %739 = vsyncpa [#allocation7], 1 }

</bundles_post_ra>
